<compile_context>
chip_gen: v5e
topology: v5e:2x2
jax: 0.10.0
libtpu: 0.0.40
codegen_flags: <defaults>
</compile_context>

<pallas_src>
import jax
import jax.numpy as jnp
from jax.experimental import pallas as pl
from jax.experimental.pallas import tpu as pltpu

LEAKY_SLOPE = 0.01   # PyTorch nn.LeakyReLU default
LANE = 128           # TPU lane width -- pad all feature / hidden / output dims to this
TILE_M = 128         # tower batch tile / score row tile (lane & sublane friendly; keeps
TILE_N = 128         #  per-tile VMEM tiny -> safe even for v7x's 64 MiB VMEM)

# budget for keeping (item embedding + one output tile), double-buffered, resident in
# VMEM inside the fused kernel.  Conservative vs the 32 MiB default scoped-VMEM limit.
_FUSE_VMEM_BUDGET = 8 * 1024 * 1024


def _round_up(x, m):
    return ((x + m - 1) // m) * m


def _pad2(x, rows, cols):
    return jnp.pad(x, ((0, rows - x.shape[0]), (0, cols - x.shape[1])))


def _mlp(x, params, n_layers):
    """Shared MLP body: Linear, (LeakyReLU, Linear)*, Sigmoid.  Weights are [in_pad, out_pad]
    (pre-transposed) so every layer is a straight x @ w on the MXU, no transposes."""
    for li in range(n_layers):
        w = params[2 * li][...]        # [in_pad, out_pad]
        b = params[2 * li + 1][...]    # [1, out_pad]
        x = jnp.dot(x, w, preferred_element_type=jnp.float32) + b
        if li < n_layers - 1:
            x = jnp.where(x >= 0, x, LEAKY_SLOPE * x)   # LeakyReLU
    return jax.nn.sigmoid(x)


# ---------------------------------------------------------------------------
# Tower kernel: MLP on a (TILE_M, F_pad) batch tile.  Weights/biases stay VMEM-resident
# across the grid (constant index_map).  Padded embedding columns are zeroed after the
# sigmoid (sigmoid(0)=0.5 would otherwise leak into the score contraction).
# ---------------------------------------------------------------------------
def _make_tower_kernel(n_layers, d_real):
    def kernel(*refs):
        x_ref = refs[0]
        params = refs[1:1 + 2 * n_layers]
        out_ref = refs[1 + 2 * n_layers]
        y = _mlp(x_ref[...], params, n_layers)
        col = jax.lax.broadcasted_iota(jnp.int32, y.shape, 1)
        out_ref[...] = jnp.where(col < d_real, y, 0.0)
    return kernel


def _tower_forward(x_pad, prepped_params, d_real):
    """x_pad: [M_pad, F_pad] zero-padded inputs.  prepped_params: list of
    (W [in_pad, out_pad], b [1, out_pad]).  Returns padded embeddings [M_pad, d_pad]."""
    m_pad, f_pad = x_pad.shape
    n_layers = len(prepped_params)
    d_pad = prepped_params[-1][0].shape[1]

    flat_args = [x_pad]
    in_specs = [pl.BlockSpec((TILE_M, f_pad), lambda i: (i, 0))]
    for w, b in prepped_params:
        flat_args += [w, b]
        in_specs += [pl.BlockSpec(w.shape, lambda i: (0, 0)),   # resident weights
                     pl.BlockSpec(b.shape, lambda i: (0, 0))]   # resident bias

    flops = 2 * m_pad * sum(w.shape[0] * w.shape[1] for w, _ in prepped_params)
    bytes_accessed = 4 * (x_pad.size
                          + sum(w.size + b.size for w, b in prepped_params)
                          + m_pad * d_pad)

    return pl.pallas_call(
        _make_tower_kernel(n_layers, d_real),
        out_shape=jax.ShapeDtypeStruct((m_pad, d_pad), jnp.float32),
        grid=(m_pad // TILE_M,),
        in_specs=in_specs,
        out_specs=pl.BlockSpec((TILE_M, d_pad), lambda i: (i, 0)),
        compiler_params=pltpu.CompilerParams(dimension_semantics=("parallel",)),
        cost_estimate=pl.CostEstimate(flops=flops, transcendentals=m_pad * d_pad,
                                      bytes_accessed=bytes_accessed),
    )(*flat_args)


# ---------------------------------------------------------------------------
# Fused user tower + score kernel: user MLP on a (TILE_M, F_pad) tile, then
# (TILE_M, d_pad) x (Mi_pad, d_pad) -> (TILE_M, Mi_pad) contracting the last (lane) dims
# of both operands directly (no it.T materialized).  The item embedding's padded columns
# are already zero, so the user side's sigmoid(0)=0.5 pad columns contribute nothing and
# need no masking.  Output last dim Mi_pad is a multiple of 128 -> unmasked vst.
# ---------------------------------------------------------------------------
def _make_fused_user_score_kernel(n_layers):
    def kernel(*refs):
        x_ref = refs[0]
        it_ref = refs[1]
        params = refs[2:2 + 2 * n_layers]
        out_ref = refs[2 + 2 * n_layers]
        u = _mlp(x_ref[...], params, n_layers)
        out_ref[...] = jax.lax.dot_general(
            u, it_ref[...],
            dimension_numbers=(((1,), (1,)), ((), ())),
            preferred_element_type=jnp.float32)
    return kernel


def _fused_user_score_forward(x_pad, prepped_params, it_emb):
    m_pad, f_pad = x_pad.shape
    mi_pad, d_pad = it_emb.shape
    n_layers = len(prepped_params)

    flat_args = [x_pad, it_emb]
    in_specs = [pl.BlockSpec((TILE_M, f_pad), lambda i: (i, 0)),
                pl.BlockSpec((mi_pad, d_pad), lambda i: (0, 0))]   # resident item emb
    for w, b in prepped_params:
        flat_args += [w, b]
        in_specs += [pl.BlockSpec(w.shape, lambda i: (0, 0)),
                     pl.BlockSpec(b.shape, lambda i: (0, 0))]

    tower_flops = 2 * m_pad * sum(w.shape[0] * w.shape[1] for w, _ in prepped_params)
    score_flops = 2 * m_pad * mi_pad * d_pad
    bytes_accessed = 4 * (x_pad.size + it_emb.size
                          + sum(w.size + b.size for w, b in prepped_params)
                          + m_pad * mi_pad)

    return pl.pallas_call(
        _make_fused_user_score_kernel(n_layers),
        out_shape=jax.ShapeDtypeStruct((m_pad, mi_pad), jnp.float32),
        grid=(m_pad // TILE_M,),
        in_specs=in_specs,
        out_specs=pl.BlockSpec((TILE_M, mi_pad), lambda i: (i, 0)),
        compiler_params=pltpu.CompilerParams(dimension_semantics=("parallel",)),
        cost_estimate=pl.CostEstimate(flops=tower_flops + score_flops,
                                      transcendentals=m_pad * d_pad,
                                      bytes_accessed=bytes_accessed),
    )(*flat_args)


# ---------------------------------------------------------------------------
# Fallback score kernel (item embedding too large to keep VMEM-resident):
# (TILE_M, d) x (TILE_N, d) -> (TILE_M, TILE_N), contracting last dims of both operands.
# ---------------------------------------------------------------------------
def _score_kernel(u_ref, it_ref, o_ref):
    o_ref[...] = jax.lax.dot_general(
        u_ref[...], it_ref[...],
        dimension_numbers=(((1,), (1,)), ((), ())),
        preferred_element_type=jnp.float32)


def _score_forward(u_emb, it_emb):
    mu_pad, d_pad = u_emb.shape
    mi_pad, _ = it_emb.shape
    flops = 2 * mu_pad * mi_pad * d_pad
    bytes_accessed = 4 * (u_emb.size + it_emb.size + mu_pad * mi_pad)
    return pl.pallas_call(
        _score_kernel,
        out_shape=jax.ShapeDtypeStruct((mu_pad, mi_pad), jnp.float32),
        grid=(mu_pad // TILE_M, mi_pad // TILE_N),
        in_specs=[pl.BlockSpec((TILE_M, d_pad), lambda i, j: (i, 0)),
                  pl.BlockSpec((TILE_N, d_pad), lambda i, j: (j, 0))],
        out_specs=pl.BlockSpec((TILE_M, TILE_N), lambda i, j: (i, j)),
        compiler_params=pltpu.CompilerParams(
            dimension_semantics=("parallel", "parallel")),  # shards across v7x's 2 TCs
        cost_estimate=pl.CostEstimate(flops=flops, transcendentals=0,
                                      bytes_accessed=bytes_accessed),
    )(u_emb, it_emb)


def _prep_tower_params(params, in_pad_first):
    """Pre-transpose Linear weights to [in, out] and zero-pad to lane-dense shapes."""
    prepped = []
    prev_pad = in_pad_first
    for w, b in params:                       # w: [out, in], b: [out]
        out_pad = _round_up(w.shape[0], LANE)
        wt = _pad2(jnp.asarray(w, jnp.float32).T, prev_pad, out_pad)
        bb = _pad2(jnp.asarray(b, jnp.float32).reshape(1, -1), 1, out_pad)
        prepped.append((wt, bb))
        prev_pad = out_pad
    return prepped


def two_tower_forward(users, items, user_params, item_params):
    """users: [n_users, user_features], items: [n_items, item_features].
    user_params / item_params: list of (W [out,in], b [out]) per Linear layer."""
    n_users, uf = users.shape
    n_items, itf = items.shape
    d_real = user_params[-1][0].shape[0]
    assert item_params[-1][0].shape[0] == d_real

    mu_pad = _round_up(n_users, TILE_M)
    mi_pad = _round_up(n_items, TILE_N)
    uf_pad = _round_up(uf, LANE)
    itf_pad = _round_up(itf, LANE)
    d_pad = _round_up(d_real, LANE)

    users_pad = _pad2(jnp.asarray(users, jnp.float32), mu_pad, uf_pad)
    items_pad = _pad2(jnp.asarray(items, jnp.float32), mi_pad, itf_pad)

    u_prepped = _prep_tower_params(user_params, uf_pad)
    i_prepped = _prep_tower_params(item_params, itf_pad)

    # Item tower first (its padded embedding columns are zeroed in-kernel).
    it_emb = _tower_forward(items_pad, i_prepped, d_real)    # [mi_pad, d_pad]

    # Fused user-tower + score if the resident item embedding (+ one lane-dense output
    # tile), double-buffered, fits comfortably in scoped VMEM; otherwise fall back.
    fused_bytes = 2 * 4 * (mi_pad * d_pad + TILE_M * mi_pad)
    if fused_bytes <= _FUSE_VMEM_BUDGET:
        scores_pad = _fused_user_score_forward(users_pad, u_prepped, it_emb)
    else:
        u_emb = _tower_forward(users_pad, u_prepped, d_real)  # [mu_pad, d_pad]
        scores_pad = _score_forward(u_emb, it_emb)            # [mu_pad, mi_pad]

    return scores_pad[:n_users, :n_items]


# ---------------------------------------------------------------------------
# Deterministic init + pure-JAX reference
# ---------------------------------------------------------------------------
def _init_linear(key, in_f, out_f):
    kw, kb = jax.random.split(key)
    bound = 1.0 / jnp.sqrt(in_f)
    w = jax.random.uniform(kw, (out_f, in_f), jnp.float32, -bound, bound)
    b = jax.random.uniform(kb, (out_f,), jnp.float32, -bound, bound)
    return w, b


def _build_tower_params(key, in_features, layer_sizes):
    params = []
    dims = [in_features] + list(layer_sizes)
    keys = jax.random.split(key, len(layer_sizes))
    for i, k in enumerate(keys):
        params.append(_init_linear(k, dims[i], dims[i + 1]))
    return params


def _reference(users, items, user_params, item_params):
    def tower(x, params):
        for li, (w, b) in enumerate(params):
            x = x @ w.T + b
            if li < len(params) - 1:
                x = jnp.where(x >= 0, x, LEAKY_SLOPE * x)
        return jax.nn.sigmoid(x)
    return tower(users, user_params) @ tower(items, item_params).T


if __name__ == "__main__":
    key = jax.random.PRNGKey(0)
    k_u, k_i, k_up, k_ip = jax.random.split(key, 4)

    n_users, n_items = 8, 16
    user_features, item_features = 24, 40
    layers = [32, 32, 16]          # user_layers == item_layers (item_layers=None case)

    users = jax.random.normal(k_u, (n_users, user_features), jnp.float32)
    items = jax.random.normal(k_i, (n_items, item_features), jnp.float32)

    user_params = _build_tower_params(k_up, user_features, layers)
    item_params = _build_tower_params(k_ip, item_features, layers)

    out = two_tower_forward(users, items, user_params, item_params)
    out = jax.block_until_ready(out)

    ref = _reference(users, items, user_params, item_params)
    assert out.shape == (n_users, n_items)
    assert jnp.allclose(out, ref, atol=1e-5, rtol=1e-5), "mismatch vs JAX reference"

    print("KERNEL_OK")
</pallas_src>

<mosaic_0001>
module attributes {stable_mosaic.version = 11 : i64} {
  func.func @kernel(%arg0: i32, %arg1: memref<128x128xf32, #tpu.memory_space<vmem>>, %arg2: memref<128x128xf32, #tpu.memory_space<vmem>>, %arg3: memref<1x128xf32, #tpu.memory_space<vmem>>, %arg4: memref<128x128xf32, #tpu.memory_space<vmem>>, %arg5: memref<1x128xf32, #tpu.memory_space<vmem>>, %arg6: memref<128x128xf32, #tpu.memory_space<vmem>>, %arg7: memref<1x128xf32, #tpu.memory_space<vmem>>, %arg8: memref<128x128xf32, #tpu.memory_space<vmem>>) attributes {dimension_semantics = [#tpu.dimension_semantics<parallel>], iteration_bounds = array<i64: 1>, scalar_prefetch = 0 : i64, scratch_operands = 0 : i64, tpu.core_type = #tpu.core_type<tc>, window_params = [{transform_indices = @transform_0, window_bounds = array<i64: 128, 128>}, {pipeline_mode = #tpu.pipeline_mode<synchronous>, transform_indices = @transform_1, window_bounds = array<i64: 128, 128>}, {pipeline_mode = #tpu.pipeline_mode<synchronous>, transform_indices = @transform_2, window_bounds = array<i64: 1, 128>}, {pipeline_mode = #tpu.pipeline_mode<synchronous>, transform_indices = @transform_3, window_bounds = array<i64: 128, 128>}, {pipeline_mode = #tpu.pipeline_mode<synchronous>, transform_indices = @transform_4, window_bounds = array<i64: 1, 128>}, {pipeline_mode = #tpu.pipeline_mode<synchronous>, transform_indices = @transform_5, window_bounds = array<i64: 128, 128>}, {pipeline_mode = #tpu.pipeline_mode<synchronous>, transform_indices = @transform_6, window_bounds = array<i64: 1, 128>}, {transform_indices = @transform_7, window_bounds = array<i64: 128, 128>}]} {
    %c0 = arith.constant 0 : index
    %c0_0 = arith.constant 0 : index
    %0 = vector.load %arg1[%c0, %c0_0] : memref<128x128xf32, #tpu.memory_space<vmem>>, vector<128x128xf32>
    %c0_1 = arith.constant 0 : index
    %c0_2 = arith.constant 0 : index
    %1 = vector.load %arg2[%c0_1, %c0_2] : memref<128x128xf32, #tpu.memory_space<vmem>>, vector<128x128xf32>
    %c0_3 = arith.constant 0 : index
    %c0_4 = arith.constant 0 : index
    %2 = vector.load %arg3[%c0_3, %c0_4] : memref<1x128xf32, #tpu.memory_space<vmem>>, vector<1x128xf32>
    %cst = arith.constant dense<0.000000e+00> : vector<128x128xf32>
    %3 = tpu.matmul %0, %1, %cst {dimension_numbers = #tpu.dot_dimension_numbers<[1], [0], [0], [1], [0, 0, 1, 1], [], []>} : vector<128x128xf32>, vector<128x128xf32>, vector<128x128xf32> -> vector<128x128xf32>
    %4 = vector.broadcast %2 : vector<1x128xf32> to vector<128x128xf32>
    %5 = arith.addf %3, %4 : vector<128x128xf32>
    %cst_5 = arith.constant 0.000000e+00 : f32
    %6 = vector.broadcast %cst_5 : f32 to vector<128x128xf32>
    %7 = arith.cmpf oge, %5, %6 : vector<128x128xf32>
    %cst_6 = arith.constant 0.00999999977 : f32
    %8 = vector.broadcast %cst_6 : f32 to vector<128x128xf32>
    %9 = arith.mulf %8, %5 : vector<128x128xf32>
    %10 = arith.select %7, %5, %9 : vector<128x128xi1>, vector<128x128xf32>
    %c0_7 = arith.constant 0 : index
    %c0_8 = arith.constant 0 : index
    %11 = vector.load %arg4[%c0_7, %c0_8] : memref<128x128xf32, #tpu.memory_space<vmem>>, vector<128x128xf32>
    %c0_9 = arith.constant 0 : index
    %c0_10 = arith.constant 0 : index
    %12 = vector.load %arg5[%c0_9, %c0_10] : memref<1x128xf32, #tpu.memory_space<vmem>>, vector<1x128xf32>
    %cst_11 = arith.constant dense<0.000000e+00> : vector<128x128xf32>
    %13 = tpu.matmul %10, %11, %cst_11 {dimension_numbers = #tpu.dot_dimension_numbers<[1], [0], [0], [1], [0, 0, 1, 1], [], []>} : vector<128x128xf32>, vector<128x128xf32>, vector<128x128xf32> -> vector<128x128xf32>
    %14 = vector.broadcast %12 : vector<1x128xf32> to vector<128x128xf32>
    %15 = arith.addf %13, %14 : vector<128x128xf32>
    %cst_12 = arith.constant 0.000000e+00 : f32
    %16 = vector.broadcast %cst_12 : f32 to vector<128x128xf32>
    %17 = arith.cmpf oge, %15, %16 : vector<128x128xf32>
    %cst_13 = arith.constant 0.00999999977 : f32
    %18 = vector.broadcast %cst_13 : f32 to vector<128x128xf32>
    %19 = arith.mulf %18, %15 : vector<128x128xf32>
    %20 = arith.select %17, %15, %19 : vector<128x128xi1>, vector<128x128xf32>
    %c0_14 = arith.constant 0 : index
    %c0_15 = arith.constant 0 : index
    %21 = vector.load %arg6[%c0_14, %c0_15] : memref<128x128xf32, #tpu.memory_space<vmem>>, vector<128x128xf32>
    %c0_16 = arith.constant 0 : index
    %c0_17 = arith.constant 0 : index
    %22 = vector.load %arg7[%c0_16, %c0_17] : memref<1x128xf32, #tpu.memory_space<vmem>>, vector<1x128xf32>
    %cst_18 = arith.constant dense<0.000000e+00> : vector<128x128xf32>
    %23 = tpu.matmul %20, %21, %cst_18 {dimension_numbers = #tpu.dot_dimension_numbers<[1], [0], [0], [1], [0, 0, 1, 1], [], []>} : vector<128x128xf32>, vector<128x128xf32>, vector<128x128xf32> -> vector<128x128xf32>
    %24 = vector.broadcast %22 : vector<1x128xf32> to vector<128x128xf32>
    %25 = arith.addf %23, %24 : vector<128x128xf32>
    %26 = arith.negf %25 : vector<128x128xf32>
    %27 = math.exp %26 : vector<128x128xf32>
    %cst_19 = arith.constant 1.000000e+00 : f32
    %28 = vector.broadcast %cst_19 : f32 to vector<128x128xf32>
    %29 = arith.addf %28, %27 : vector<128x128xf32>
    %30 = arith.divf %28, %29 : vector<128x128xf32>
    %31 = tpu.iota {dimensions = array<i32: 1>} : vector<128x128xi32>
    %c16_i32 = arith.constant 16 : i32
    %32 = vector.broadcast %c16_i32 : i32 to vector<128x128xi32>
    %33 = arith.cmpi slt, %31, %32 : vector<128x128xi32>
    %cst_20 = arith.constant 0.000000e+00 : f32
    %34 = vector.broadcast %cst_20 : f32 to vector<128x128xf32>
    %35 = arith.select %33, %30, %34 : vector<128x128xi1>, vector<128x128xf32>
    %c0_21 = arith.constant 0 : index
    %c0_22 = arith.constant 0 : index
    %36 = vector.load %arg8[%c0_21, %c0_22] : memref<128x128xf32, #tpu.memory_space<vmem>>, vector<128x128xf32>
    tpu.vector_store %arg8[%c0_21, %c0_22], %35 {strides = array<i32>} : memref<128x128xf32, #tpu.memory_space<vmem>>, vector<128x128xf32>,
    return
  }
  func.func @transform_0(%arg0: i32) -> (i32, i32) {
    %c0_i32 = arith.constant 0 : i32
    %c0_i32_0 = arith.constant 0 : i32
    return %arg0, %c0_i32 : i32, i32
  }
  func.func @transform_1(%arg0: i32) -> (i32, i32) {
    %c0_i32 = arith.constant 0 : i32
    %c0_i32_0 = arith.constant 0 : i32
    %c0_i32_1 = arith.constant 0 : i32
    return %c0_i32, %c0_i32_0 : i32, i32
  }
  func.func @transform_2(%arg0: i32) -> (i32, i32) {
    %c0_i32 = arith.constant 0 : i32
    %c0_i32_0 = arith.constant 0 : i32
    %c0_i32_1 = arith.constant 0 : i32
    return %c0_i32, %c0_i32_0 : i32, i32
  }
  func.func @transform_3(%arg0: i32) -> (i32, i32) {
    %c0_i32 = arith.constant 0 : i32
    %c0_i32_0 = arith.constant 0 : i32
    %c0_i32_1 = arith.constant 0 : i32
    return %c0_i32, %c0_i32_0 : i32, i32
  }
  func.func @transform_4(%arg0: i32) -> (i32, i32) {
    %c0_i32 = arith.constant 0 : i32
    %c0_i32_0 = arith.constant 0 : i32
    %c0_i32_1 = arith.constant 0 : i32
    return %c0_i32, %c0_i32_0 : i32, i32
  }
  func.func @transform_5(%arg0: i32) -> (i32, i32) {
    %c0_i32 = arith.constant 0 : i32
    %c0_i32_0 = arith.constant 0 : i32
    %c0_i32_1 = arith.constant 0 : i32
    return %c0_i32, %c0_i32_0 : i32, i32
  }
  func.func @transform_6(%arg0: i32) -> (i32, i32) {
    %c0_i32 = arith.constant 0 : i32
    %c0_i32_0 = arith.constant 0 : i32
    %c0_i32_1 = arith.constant 0 : i32
    return %c0_i32, %c0_i32_0 : i32, i32
  }
  func.func @transform_7(%arg0: i32) -> (i32, i32) {
    %c0_i32 = arith.constant 0 : i32
    %c0_i32_0 = arith.constant 0 : i32
    return %arg0, %c0_i32 : i32, i32
  }
}

</mosaic_0001>

<bundles_post_ra>
// kernel: tpu_custom_call.1
= control target key start
LH: loop header
LB: loop body
LE: loop exit
PB: predicated region body
PF: predicated region fallthrough
CT: control target
= control target key end

     0   :  { %12 = vsyncpa [#allocation3], 0  ;;  %s1382_s0 = inlined_call_operand.hbm [shape: f32[128,128], index: 0, kind: input, shape index: {}]   ;;  %s1383_s1 = inlined_call_operand.hbm [shape: f32[128,128], index: 1, kind: input, shape index: {}]   ;;  %s1384_s2 = inlined_call_operand.vmem [shape: f32[1,128], index: 2, kind: input, shape index: {}]   ;;  %s1385_s3 = inlined_call_operand.hbm [shape: f32[128,128], index: 3, kind: input, shape index: {}]   ;;  %s1386_s4 = inlined_call_operand.vmem [shape: f32[1,128], index: 4, kind: input, shape index: {}]   ;;  %s1387_s5 = inlined_call_operand.hbm [shape: f32[128,128], index: 5, kind: input, shape index: {}]   ;;  %s1388_s6 = inlined_call_operand.vmem [shape: f32[1,128], index: 6, kind: input, shape index: {}]   ;;  %s1389_s7 = inlined_call_operand.hbm [shape: f32[128,128], index: 7, kind: output, shape index: {}]  }
   0x1   :  { %13 = vsyncpa [#allocation6], 0 }
   0x2   :  { %14 = vsyncpa [#allocation9], 0 }
   0x3   :  { %15 = vsyncpa [#allocation4], 0  ;;  %s33_s26 = sshll.u32 %s1383_s1, 4  ;;  %s1083_s27 = smov [#allocation5]   ;;  %s34_s26 = int_to_ptr.hbm [resolvable:$true] %s33_s26 }
   0x4   :  { %s35_s28 = sshll.u32 %s1083_s27, 4  ;;  %s20_s8 = sshll.u32 %s1382_s0, 4  ;;  %s36_s28 = int_to_ptr.vmem [resolvable:$true] %s35_s28  ;;  %s21_s8 = int_to_ptr.hbm [resolvable:$true] %s20_s8 }
   0x5   :  { %s1084_s9 = smov 128   ;;  %s1085_s10 = smov 8  }
   0x6   :  { %41 = dma.hbm_to_vmem [thread:$0]  %s34_s26, 2048, %s36_s28, [#allocation6], %s1084_s9, %s1084_s9, %s1085_s10  }
   0x7   :  { %s1086_s11 = smov [#allocation2]   ;;  %s48_s1 = sshll.u32 %s1385_s3, 4  ;;  %s49_s1 = int_to_ptr.hbm [resolvable:$true] %s48_s1 }
   0x8   :  { %s22_s12 = sshll.u32 %s1086_s11, 4  ;;  %s63_s16 = sshll.u32 %s1387_s5, 4  ;;  %s23_s12 = int_to_ptr.vmem [resolvable:$true] %s22_s12  ;;  %s64_s16 = int_to_ptr.hbm [resolvable:$true] %s63_s16 }
   0x9   :  { %28 = dma.hbm_to_vmem [thread:$0]  %s21_s8, 2048, %s23_s12, [#allocation3], %s1084_s9, %s1084_s9, %s1085_s10  }
   0xa   :  { %s1087_s17 = smov [#allocation7]   ;;  %s1088_s19 = smov [#allocation8]  }
   0xb   :  { %s50_s18 = sshll.u32 %s1087_s17, 4  ;;  %s65_s3 = sshll.u32 %s1088_s19, 4  ;;  %s51_s18 = int_to_ptr.vmem [resolvable:$true] %s50_s18  ;;  %s66_s3 = int_to_ptr.vmem [resolvable:$true] %s65_s3 }
   0xc   :  { %56 = dma.hbm_to_vmem [thread:$0]  %s49_s1, 2048, %s51_s18, [#allocation6], %s1084_s9, %s1084_s9, %s1085_s10  }
   0xd   :  { %71 = dma.hbm_to_vmem [thread:$0]  %s64_s16, 2048, %s66_s3, [#allocation9], %s1084_s9, %s1084_s9, %s1085_s10  }
   0xe   :  { %1075 = dma.done.wait [#allocation3], 2048  }
   0xf   :  { %1076 = vsyncadd [#allocation3], 4294965248 }
  0x10   :  { %1077 = dma.done.wait [#allocation6], 4096  }
  0x11   :  { %1078 = vsyncadd [#allocation6], 4294963200 }
  0x12   :  { %1079 = dma.done.wait [#allocation9], 2048  }
  0x13   :  { %1080 = vsyncadd [#allocation9], 4294965248  ;;  %v121_v0 = vld [vmem:[#allocation5 + $0x78] sm:$0xff]  ;;  %v120_v1 = vld [vmem:[#allocation5 + $0x70] sm:$0xff]  ;;  %s802_s26 = sshll.u32 %s1389_s7, 4  ;;  %s803_s26 = int_to_ptr.hbm [resolvable:$true] %s802_s26 }
  0x14   :  { %126 = vmatpush.msra.mxu0 %v121_v0  ;;  %833 = vmatpush.msra.mxu3 %v121_v0  ;;  %v119_v2 = vld [vmem:[#allocation5 + $0x68] sm:$0xff]  ;;  %v118_v3 = vld [vmem:[#allocation5 + $0x60] sm:$0xff]  ;;  %v117_v4 = vld [vmem:[#allocation5 + $0x58] sm:$0xff] }
  0x15   :  { %v116_v5 = vld [vmem:[#allocation5 + $0x50] sm:$0xff]  ;;  %v115_v6 = vld [vmem:[#allocation5 + $0x48] sm:$0xff]  ;;  %v114_v7 = vld [vmem:[#allocation5 + $0x40] sm:$0xff] }
  0x16   :  { %127 = vmatpush.msra.mxu0 %v120_v1  ;;  %834 = vmatpush.msra.mxu3 %v120_v1  ;;  %v113_v8 = vld [vmem:[#allocation5 + $0x38] sm:$0xff]  ;;  %v112_v9 = vld [vmem:[#allocation5 + $0x30] sm:$0xff]  ;;  %v111_v10 = vld [vmem:[#allocation5 + $0x28] sm:$0xff] }
  0x17   :  { %v110_v11 = vld [vmem:[#allocation5 + $0x20] sm:$0xff]  ;;  %v109_v12 = vld [vmem:[#allocation5 + $0x18] sm:$0xff]  ;;  %v108_v13 = vld [vmem:[#allocation5 + $0x10] sm:$0xff] }
  0x18   :  { %128 = vmatpush.msra.mxu0 %v119_v2  ;;  %835 = vmatpush.msra.mxu3 %v119_v2  ;;  %v107_v14 = vld [vmem:[#allocation5 + $0x8] sm:$0xff]  ;;  %v106_v15 = vld [vmem:[#allocation5] sm:$0xff]  ;;  %v92_v20 = vld [vmem:[#allocation2 + $0x10] sm:$0xff] }
  0x19   :  { %v90_v16 = vld [vmem:[#allocation2] sm:$0xff]  ;;  %v91_v18 = vld [vmem:[#allocation2 + $0x8] sm:$0xff]  ;;  %v104_v21 = vld [vmem:[#allocation2 + $0x70] sm:$0xff] }
  0x1a   :  { %129 = vmatpush.msra.mxu0 %v118_v3  ;;  %836 = vmatpush.msra.mxu3 %v118_v3  ;;  %v102_v17 = vld [vmem:[#allocation2 + $0x60] sm:$0xff]  ;;  %v103_v19 = vld [vmem:[#allocation2 + $0x68] sm:$0xff]  ;;  %v93_v22 = vld [vmem:[#allocation2 + $0x18] sm:$0xff] }
  0x1b   :  { %v105_v23 = vld [vmem:[#allocation2 + $0x78] sm:$0xff]  ;;  %v94_v24 = vld [vmem:[#allocation2 + $0x20] sm:$0xff]  ;;  %v95_v25 = vld [vmem:[#allocation2 + $0x28] sm:$0xff] }
  0x1c   :  { %130 = vmatpush.msra.mxu0 %v117_v4  ;;  %837 = vmatpush.msra.mxu3 %v117_v4  ;;  %v96_v26 = vld [vmem:[#allocation2 + $0x30] sm:$0xff]  ;;  %v97_v27 = vld [vmem:[#allocation2 + $0x38] sm:$0xff]  ;;  %v252_v30 = vld [vmem:[#allocation7 + $0x68] sm:$0xff] }
  0x1d   :  { %v254_v28 = vld [vmem:[#allocation7 + $0x78] sm:$0xff]  ;;  %v253_v29 = vld [vmem:[#allocation7 + $0x70] sm:$0xff]  ;;  %v251_v31 = vld [vmem:[#allocation7 + $0x60] sm:$0xff] }
  0x1e   :  { %131 = vmatpush.msra.mxu0 %v116_v5  ;;  %838 = vmatpush.msra.mxu3 %v116_v5  ;;  %v98_v32 = vld [vmem:[#allocation2 + $0x40] sm:$0xff]  ;;  %v250_v33 = vld [vmem:[#allocation7 + $0x58] sm:$0xff]  ;;  %v249_v34 = vld [vmem:[#allocation7 + $0x50] sm:$0xff] }
  0x1f   :  { %259 = vmatpush.msra.mxu1 %v254_v28  ;;  %v248_v35 = vld [vmem:[#allocation7 + $0x48] sm:$0xff]  ;;  %v247_v36 = vld [vmem:[#allocation7 + $0x40] sm:$0xff]  ;;  %v246_v38 = vld [vmem:[#allocation7 + $0x38] sm:$0xff] }
  0x20   :  { %132 = vmatpush.msra.mxu0 %v115_v6  ;;  %839 = vmatpush.msra.mxu3 %v115_v6  ;;  %v99_v37 = vld [vmem:[#allocation2 + $0x48] sm:$0xff]  ;;  %v245_v39 = vld [vmem:[#allocation7 + $0x30] sm:$0xff]  ;;  %v243_v41 = vld [vmem:[#allocation7 + $0x20] sm:$0xff] }
  0x21   :  { %260 = vmatpush.msra.mxu1 %v253_v29  ;;  %v244_v40 = vld [vmem:[#allocation7 + $0x28] sm:$0xff]  ;;  %v100_v42 = vld [vmem:[#allocation2 + $0x50] sm:$0xff]  ;;  %v242_v43 = vld [vmem:[#allocation7 + $0x18] sm:$0xff] }
  0x22   :  { %133 = vmatpush.msra.mxu0 %v114_v7  ;;  %840 = vmatpush.msra.mxu3 %v114_v7  ;;  %v101_v44 = vld [vmem:[#allocation2 + $0x58] sm:$0xff]  ;;  %v241_v45 = vld [vmem:[#allocation7 + $0x10] sm:$0xff]  ;;  %v240_v46 = vld [vmem:[#allocation7 + $0x8] sm:$0xff] }
  0x23   :  { %261 = vmatpush.msra.mxu1 %v252_v30  ;;  %v239_v47 = vld [vmem:[#allocation7] sm:$0xff] }
  0x24   :  { %134 = vmatpush.msra.mxu0 %v113_v8  ;;  %841 = vmatpush.msra.mxu3 %v113_v8  ;;  %v1157_v48 = vld [vmem:[%s1384_s2] ss:$0 sm:$0xff] }
  0x25   :  { %262 = vmatpush.msra.mxu1 %v251_v31 }
  0x26   :  { %135 = vmatpush.msra.mxu0 %v112_v9  ;;  %842 = vmatpush.msra.mxu3 %v112_v9 }
  0x27   :  { %263 = vmatpush.msra.mxu1 %v250_v33 }
  0x28   :  { %136 = vmatpush.msra.mxu0 %v111_v10  ;;  %843 = vmatpush.msra.mxu3 %v111_v10 }
  0x29   :  { %264 = vmatpush.msra.mxu1 %v249_v34 }
  0x2a   :  { %137 = vmatpush.msra.mxu0 %v110_v11  ;;  %844 = vmatpush.msra.mxu3 %v110_v11 }
  0x2b   :  { %265 = vmatpush.msra.mxu1 %v248_v35 }
  0x2c   :  { %138 = vmatpush.msra.mxu0 %v109_v12  ;;  %845 = vmatpush.msra.mxu3 %v109_v12 }
  0x2d   :  { %266 = vmatpush.msra.mxu1 %v247_v36 }
  0x2e   :  { %139 = vmatpush.msra.mxu0 %v108_v13  ;;  %846 = vmatpush.msra.mxu3 %v108_v13 }
  0x2f   :  { %267 = vmatpush.msra.mxu1 %v246_v38 }
  0x30   :  { %140 = vmatpush.msra.mxu0 %v107_v14  ;;  %847 = vmatpush.msra.mxu3 %v107_v14 }
  0x31   :  { %268 = vmatpush.msra.mxu1 %v245_v39 }
  0x32   :  { %141 = vmatpush.msra.mxu0 %v106_v15  ;;  %848 = vmatpush.msra.mxu3 %v106_v15 }
  0x33   :  { %142 = vmatmul.f32.vlgmr.msra.gmra.mxu0 %v90_v16  ;;  %178 = vmatmul.f32.vlgmr.msra.gmra.mxu3 %v102_v17 }
  0x34   :  { %849 = vmatpush.msrb.mxu3 %v254_v28  ;;  %269 = vmatpush.msra.mxu1 %v244_v40 }
  0x36   :  { %850 = vmatpush.msrb.mxu3 %v253_v29  ;;  %270 = vmatpush.msra.mxu1 %v243_v41 }
  0x38   :  { %851 = vmatpush.msrb.mxu3 %v252_v30  ;;  %271 = vmatpush.msra.mxu1 %v242_v43 }
  0x3a   :  { %852 = vmatpush.msrb.mxu3 %v251_v31  ;;  %272 = vmatpush.msra.mxu1 %v241_v45 }
  0x3b   :  { %145 = vmatmul.f32.gmra.mxu0 %v91_v18  ;;  %181 = vmatmul.f32.gmra.mxu3 %v103_v19 }
  0x3c   :  { %853 = vmatpush.msrb.mxu3 %v250_v33  ;;  %273 = vmatpush.msra.mxu1 %v240_v46  ;;  %v387_v33 = vld [vmem:[#allocation8 + $0x78] sm:$0xff] }
  0x3d   :  { %392 = vmatpush.msra.mxu2 %v387_v33 }
  0x3e   :  { %854 = vmatpush.msrb.mxu3 %v249_v34  ;;  %274 = vmatpush.msra.mxu1 %v239_v47  ;;  %v386_v34 = vld [vmem:[#allocation8 + $0x70] sm:$0xff] }
  0x3f   :  { %393 = vmatpush.msra.mxu2 %v386_v34 }
  0x40   :  { %855 = vmatpush.msrb.mxu3 %v248_v35 }
  0x42   :  { %856 = vmatpush.msrb.mxu3 %v247_v36  ;;  %v385_v36 = vld [vmem:[#allocation8 + $0x68] sm:$0xff] }
  0x43   :  { %148 = vmatmul.f32.gmra.mxu0 %v92_v20  ;;  %184 = vmatmul.f32.gmra.mxu3 %v104_v21 }
  0x44   :  { %857 = vmatpush.msrb.mxu3 %v246_v38  ;;  %v384_v38 = vld [vmem:[#allocation8 + $0x60] sm:$0xff]  ;;  %394 = vmatpush.msra.mxu2 %v385_v36 }
  0x46   :  { %858 = vmatpush.msrb.mxu3 %v245_v39  ;;  %395 = vmatpush.msra.mxu2 %v384_v38 }
  0x48   :  { %859 = vmatpush.msrb.mxu3 %v244_v40  ;;  %v383_v40 = vld [vmem:[#allocation8 + $0x58] sm:$0xff] }
  0x49   :  { %396 = vmatpush.msra.mxu2 %v383_v40 }
  0x4a   :  { %860 = vmatpush.msrb.mxu3 %v243_v41 }
  0x4b   :  { %151 = vmatmul.f32.gmra.mxu0 %v93_v22  ;;  %187 = vmatmul.f32.gmra.mxu3 %v105_v23 }
  0x4c   :  { %861 = vmatpush.msrb.mxu3 %v242_v43 }
  0x4e   :  { %862 = vmatpush.msrb.mxu3 %v241_v45 }
  0x50   :  { %863 = vmatpush.msrb.mxu3 %v240_v46  ;;  %v380_v46 = vld [vmem:[#allocation8 + $0x40] sm:$0xff] }
  0x52   :  { %864 = vmatpush.msrb.mxu3 %v239_v47 }
  0x53   :  { %154 = vmatmul.f32.gmra.mxu0 %v94_v24 }
  0x54   :  { %865 = vmatpush.msra.mxu3 %v387_v33 }
  0x56   :  { %866 = vmatpush.msra.mxu3 %v386_v34 }
  0x58   :  { %867 = vmatpush.msra.mxu3 %v385_v36 }
  0x5a   :  { %868 = vmatpush.msra.mxu3 %v384_v38 }
  0x5b   :  { %157 = vmatmul.f32.gmra.mxu0 %v95_v25 }
  0x5c   :  { %869 = vmatpush.msra.mxu3 %v383_v40 }
  0x63   :  { %160 = vmatmul.f32.gmra.mxu0 %v96_v26 }
  0x6b   :  { %163 = vmatmul.f32.gmra.mxu0 %v97_v27 }
  0x73   :  { %166 = vmatmul.f32.gmra.mxu0 %v98_v32 }
  0x7b   :  { %169 = vmatmul.f32.gmra.mxu0 %v99_v37 }
  0x83   :  { %172 = vmatmul.f32.gmra.mxu0 %v100_v42  ;;  %v382_v42 = vld [vmem:[#allocation8 + $0x50] sm:$0xff] }
  0x84   :  { %397 = vmatpush.msra.mxu2 %v382_v42  ;;  %870 = vmatpush.msra.mxu3 %v382_v42 }
  0x8b   :  { %175 = vmatmul.f32.gmra.mxu0 %v101_v44  ;;  %v381_v44 = vld [vmem:[#allocation8 + $0x48] sm:$0xff] }
  0x8c   :  { %398 = vmatpush.msra.mxu2 %v381_v44  ;;  %871 = vmatpush.msra.mxu3 %v381_v44 }
  0x8e   :  { %399 = vmatpush.msra.mxu2 %v380_v46  ;;  %872 = vmatpush.msra.mxu3 %v380_v46 }
  0xb0   :  { %v143_v49 = vpop.f32.mrf.mxu0 }
  0xb1   :  { %v144_v50 = vadd.f32 %v1157_v48, %v143_v49  ;;  %v379_v49 = vld [vmem:[#allocation8 + $0x38] sm:$0xff] }
  0xb2   :  { %400 = vmatpush.msra.mxu2 %v379_v49  ;;  %873 = vmatpush.msra.mxu3 %v379_v49 }
  0xb3   :  { %vm191_vm0 = vcmp.ge.f32.partialorder %v144_v50, 0.0  ;;  %v207_v51 = vmul.f32 0.01, %v144_v50 }
  0xb5   :  { %v223_v52 = vsel %vm191_vm0, %v144_v50, %v207_v51  ;;  %v378_v51 = vld [vmem:[#allocation8 + $0x30] sm:$0xff] }
  0xb6   :  { %275 = vmatmul.f32.vlgmr.msra.gmra.mxu1 %v223_v52  ;;  %v179_v55 = vpop.f32.mrf.mxu3  ;;  %401 = vmatpush.msra.mxu2 %v378_v51 }
  0xb7   :  { %v180_v56 = vadd.f32 %v1157_v48, %v179_v55  ;;  %874 = vmatpush.msra.mxu3 %v378_v51  ;;  %v376_v55 = vld [vmem:[#allocation8 + $0x20] sm:$0xff] }
  0xb8   :  { %v146_v53 = vpop.f32.mrf.mxu0 }
  0xb9   :  { %v147_v54 = vadd.f32 %v1157_v48, %v146_v53  ;;  %v219_v58 = vmul.f32 0.01, %v180_v56  ;;  %vm203_vm2 = vcmp.ge.f32.partialorder %v180_v56, 0.0  ;;  %v377_v53 = vld [vmem:[#allocation8 + $0x28] sm:$0xff] }
  0xba   :  { %402 = vmatpush.msra.mxu2 %v377_v53  ;;  %875 = vmatpush.msra.mxu3 %v377_v53 }
  0xbb   :  { %vm192_vm1 = vcmp.ge.f32.partialorder %v147_v54, 0.0  ;;  %v208_v57 = vmul.f32 0.01, %v147_v54  ;;  %v235_v60 = vsel %vm203_vm2, %v180_v56, %v219_v58 }
  0xbc   :  { %311 = vmatmul.f32.vlgmr.msrb.gmra.mxu3 %v235_v60  ;;  %403 = vmatpush.msra.mxu2 %v376_v55 }
  0xbd   :  { %v224_v59 = vsel %vm192_vm1, %v147_v54, %v208_v57  ;;  %v375_v57 = vld [vmem:[#allocation8 + $0x18] sm:$0xff]  ;;  %876 = vmatpush.msra.mxu3 %v376_v55 }
  0xbe   :  { %278 = vmatmul.f32.gmra.mxu1 %v224_v59  ;;  %v182_v63 = vpop.f32.mrf.mxu3  ;;  %404 = vmatpush.msra.mxu2 %v375_v57 }
  0xbf   :  { %v183_v0 = vadd.f32 %v1157_v48, %v182_v63  ;;  %877 = vmatpush.msra.mxu3 %v375_v57  ;;  %v374_v63 = vld [vmem:[#allocation8 + $0x10] sm:$0xff] }
  0xc0   :  { %v149_v61 = vpop.f32.mrf.mxu0  ;;  %405 = vmatpush.msra.mxu2 %v374_v63 }
  0xc1   :  { %v150_v62 = vadd.f32 %v1157_v48, %v149_v61  ;;  %v220_v2 = vmul.f32 0.01, %v183_v0  ;;  %vm204_vm4 = vcmp.ge.f32.partialorder %v183_v0, 0.0  ;;  %878 = vmatpush.msra.mxu3 %v374_v63 }
  0xc3   :  { %vm193_vm3 = vcmp.ge.f32.partialorder %v150_v62, 0.0  ;;  %v209_v1 = vmul.f32 0.01, %v150_v62  ;;  %v236_v4 = vsel %vm204_vm4, %v183_v0, %v220_v2  ;;  %v373_v0 = vld [vmem:[#allocation8 + $0x8] sm:$0xff]  ;;  %v1178_v2 = vld [vmem:[%s1386_s4] ss:$0 sm:$0xff] }
  0xc4   :  { %314 = vmatmul.f32.gmra.mxu3 %v236_v4  ;;  %406 = vmatpush.msra.mxu2 %v373_v0 }
  0xc5   :  { %v225_v3 = vsel %vm193_vm3, %v150_v62, %v209_v1  ;;  %v372_v1 = vld [vmem:[#allocation8] sm:$0xff]  ;;  %879 = vmatpush.msra.mxu3 %v373_v0 }
  0xc6   :  { %281 = vmatmul.f32.gmra.mxu1 %v225_v3  ;;  %v185_v7 = vpop.f32.mrf.mxu3  ;;  %407 = vmatpush.msra.mxu2 %v372_v1 }
  0xc7   :  { %v186_v8 = vadd.f32 %v1157_v48, %v185_v7  ;;  %880 = vmatpush.msra.mxu3 %v372_v1 }
  0xc8   :  { %v152_v5 = vpop.f32.mrf.mxu0 }
  0xc9   :  { %v153_v6 = vadd.f32 %v1157_v48, %v152_v5  ;;  %v221_v10 = vmul.f32 0.01, %v186_v8  ;;  %vm205_vm6 = vcmp.ge.f32.partialorder %v186_v8, 0.0 }
  0xcb   :  { %vm194_vm5 = vcmp.ge.f32.partialorder %v153_v6, 0.0  ;;  %v210_v9 = vmul.f32 0.01, %v153_v6  ;;  %v237_v12 = vsel %vm205_vm6, %v186_v8, %v221_v10 }
  0xcc   :  { %317 = vmatmul.f32.gmra.mxu3 %v237_v12 }
  0xcd   :  { %v226_v11 = vsel %vm194_vm5, %v153_v6, %v210_v9 }
  0xce   :  { %284 = vmatmul.f32.gmra.mxu1 %v226_v11  ;;  %v188_v15 = vpop.f32.mrf.mxu3 }
  0xcf   :  { %v189_v16 = vadd.f32 %v1157_v48, %v188_v15 }
  0xd0   :  { %v155_v13 = vpop.f32.mrf.mxu0 }
  0xd1   :  { %v156_v14 = vadd.f32 %v1157_v48, %v155_v13  ;;  %v222_v18 = vmul.f32 0.01, %v189_v16  ;;  %vm206_vm8 = vcmp.ge.f32.partialorder %v189_v16, 0.0 }
  0xd3   :  { %vm195_vm7 = vcmp.ge.f32.partialorder %v156_v14, 0.0  ;;  %v211_v17 = vmul.f32 0.01, %v156_v14  ;;  %v238_v20 = vsel %vm206_vm8, %v189_v16, %v222_v18 }
  0xd4   :  { %320 = vmatmul.f32.gmra.mxu3 %v238_v20 }
  0xd5   :  { %v227_v19 = vsel %vm195_vm7, %v156_v14, %v211_v17 }
  0xd6   :  { %287 = vmatmul.f32.gmra.mxu1 %v227_v19 }
  0xd8   :  { %v158_v21 = vpop.f32.mrf.mxu0 }
  0xd9   :  { %v159_v22 = vadd.f32 %v1157_v48, %v158_v21 }
  0xdb   :  { %vm196_vm9 = vcmp.ge.f32.partialorder %v159_v22, 0.0  ;;  %v212_v23 = vmul.f32 0.01, %v159_v22 }
  0xdd   :  { %v228_v24 = vsel %vm196_vm9, %v159_v22, %v212_v23 }
  0xde   :  { %290 = vmatmul.f32.gmra.mxu1 %v228_v24 }
  0xe0   :  { %v161_v25 = vpop.f32.mrf.mxu0 }
  0xe1   :  { %v162_v26 = vadd.f32 %v1157_v48, %v161_v25 }
  0xe3   :  { %vm197_vm10 = vcmp.ge.f32.partialorder %v162_v26, 0.0  ;;  %v213_v27 = vmul.f32 0.01, %v162_v26 }
  0xe5   :  { %v229_v28 = vsel %vm197_vm10, %v162_v26, %v213_v27 }
  0xe6   :  { %293 = vmatmul.f32.gmra.mxu1 %v229_v28 }
  0xe8   :  { %v164_v29 = vpop.f32.mrf.mxu0 }
  0xe9   :  { %v165_v30 = vadd.f32 %v1157_v48, %v164_v29 }
  0xeb   :  { %vm198_vm11 = vcmp.ge.f32.partialorder %v165_v30, 0.0  ;;  %v214_v31 = vmul.f32 0.01, %v165_v30 }
  0xed   :  { %v230_v32 = vsel %vm198_vm11, %v165_v30, %v214_v31 }
  0xee   :  { %296 = vmatmul.f32.gmra.mxu1 %v230_v32 }
  0xf0   :  { %v167_v35 = vpop.f32.mrf.mxu0 }
  0xf1   :  { %v168_v37 = vadd.f32 %v1157_v48, %v167_v35 }
  0xf3   :  { %vm199_vm12 = vcmp.ge.f32.partialorder %v168_v37, 0.0  ;;  %v215_v39 = vmul.f32 0.01, %v168_v37 }
  0xf5   :  { %v231_v41 = vsel %vm199_vm12, %v168_v37, %v215_v39 }
  0xf6   :  { %299 = vmatmul.f32.gmra.mxu1 %v231_v41 }
  0xf8   :  { %v170_v43 = vpop.f32.mrf.mxu0 }
  0xf9   :  { %v171_v45 = vadd.f32 %v1157_v48, %v170_v43 }
  0xfb   :  { %vm200_vm13 = vcmp.ge.f32.partialorder %v171_v45, 0.0  ;;  %v216_v47 = vmul.f32 0.01, %v171_v45 }
  0xfd   :  { %v232_v50 = vsel %vm200_vm13, %v171_v45, %v216_v47 }
  0xfe   :  { %302 = vmatmul.f32.gmra.mxu1 %v232_v50 }
 0x100   :  { %v173_v52 = vpop.f32.mrf.mxu0 }
 0x101   :  { %v174_v54 = vadd.f32 %v1157_v48, %v173_v52 }
 0x103   :  { %vm201_vm14 = vcmp.ge.f32.partialorder %v174_v54, 0.0  ;;  %v217_v56 = vmul.f32 0.01, %v174_v54 }
 0x105   :  { %v233_v58 = vsel %vm201_vm14, %v174_v54, %v217_v56 }
 0x106   :  { %305 = vmatmul.f32.gmra.mxu1 %v233_v58 }
 0x108   :  { %v176_v59 = vpop.f32.mrf.mxu0 }
 0x109   :  { %v177_v60 = vadd.f32 %v1157_v48, %v176_v59 }
 0x10b   :  { %vm202_vm15 = vcmp.ge.f32.partialorder %v177_v60, 0.0  ;;  %v218_v61 = vmul.f32 0.01, %v177_v60 }
 0x10d   :  { %v234_v62 = vsel %vm202_vm15, %v177_v60, %v218_v61 }
 0x10e   :  { %308 = vmatmul.f32.gmra.mxu1 %v234_v62 }
 0x133   :  { %v276_v3 = vpop.f32.mrf.mxu1 }
 0x134   :  { %v277_v48 = vadd.f32 %v1178_v2, %v276_v3 }
 0x136   :  { %vm324_vm0 = vcmp.ge.f32.partialorder %v277_v48, 0.0  ;;  %v340_v4 = vmul.f32 0.01, %v277_v48 }
 0x138   :  { %v356_v5 = vsel %vm324_vm0, %v277_v48, %v340_v4  ;;  %v1199_v48 = vld [vmem:[%s1388_s6] ss:$0 sm:$0xff]  ;;  %s1089_s6 = smov [#allocation10]  }
 0x139   :  { %408 = vmatmul.f32.vlgmr.msra.gmra.mxu2 %v356_v5  ;;  %s800_s23 = sshll.u32 %s1089_s6, 4  ;;  %s801_s23 = int_to_ptr.vmem [resolvable:$true] %s800_s23 }
 0x13b   :  { %v279_v6 = vpop.f32.mrf.mxu1 }
 0x13c   :  { %v280_v7 = vadd.f32 %v1178_v2, %v279_v6 }
 0x13e   :  { %vm325_vm1 = vcmp.ge.f32.partialorder %v280_v7, 0.0  ;;  %v341_v8 = vmul.f32 0.01, %v280_v7 }
 0x13f   :  { %v312_v10 = vpop.f32.mrf.mxu3 }
 0x140   :  { %v357_v9 = vsel %vm325_vm1, %v280_v7, %v341_v8  ;;  %v313_v12 = vadd.f32 %v1178_v2, %v312_v10 }
 0x141   :  { %411 = vmatmul.f32.gmra.mxu2 %v357_v9 }
 0x142   :  { %vm336_vm2 = vcmp.ge.f32.partialorder %v313_v12, 0.0  ;;  %v352_v14 = vmul.f32 0.01, %v313_v12 }
 0x143   :  { %v282_v11 = vpop.f32.mrf.mxu1 }
 0x144   :  { %v283_v13 = vadd.f32 %v1178_v2, %v282_v11  ;;  %v368_v16 = vsel %vm336_vm2, %v313_v12, %v352_v14 }
 0x145   :  { %444 = vmatmul.f32.vlgmr.msra.gmra.mxu3 %v368_v16 }
 0x146   :  { %vm326_vm3 = vcmp.ge.f32.partialorder %v283_v13, 0.0  ;;  %v342_v15 = vmul.f32 0.01, %v283_v13 }
 0x147   :  { %v315_v18 = vpop.f32.mrf.mxu3 }
 0x148   :  { %v358_v17 = vsel %vm326_vm3, %v283_v13, %v342_v15  ;;  %v316_v20 = vadd.f32 %v1178_v2, %v315_v18 }
 0x149   :  { %414 = vmatmul.f32.gmra.mxu2 %v358_v17 }
 0x14a   :  { %vm337_vm4 = vcmp.ge.f32.partialorder %v316_v20, 0.0  ;;  %v353_v22 = vmul.f32 0.01, %v316_v20 }
 0x14b   :  { %v285_v19 = vpop.f32.mrf.mxu1 }
 0x14c   :  { %v286_v21 = vadd.f32 %v1178_v2, %v285_v19  ;;  %v369_v24 = vsel %vm337_vm4, %v316_v20, %v353_v22  ;;  %v761_v19 = vlaneseq }
 0x14d   :  { %447 = vmatmul.f32.gmra.mxu3 %v369_v24 }
 0x14e   :  { %vm327_vm5 = vcmp.ge.f32.partialorder %v286_v21, 0.0  ;;  %v343_v23 = vmul.f32 0.01, %v286_v21 }
 0x14f   :  { %v318_v26 = vpop.f32.mrf.mxu3 }
 0x150   :  { %v359_v25 = vsel %vm327_vm5, %v286_v21, %v343_v23  ;;  %v319_v28 = vadd.f32 %v1178_v2, %v318_v26 }
 0x151   :  { %417 = vmatmul.f32.gmra.mxu2 %v359_v25  ;;  %v1205_v25 = vand.u32 127, %v761_v19 }
 0x152   :  { %vm338_vm6 = vcmp.ge.f32.partialorder %v319_v28, 0.0  ;;  %v354_v30 = vmul.f32 0.01, %v319_v28 }
 0x153   :  { %v288_v27 = vpop.f32.mrf.mxu1  ;;  %vm763_vm3 = vcmp.lt.s32.totalorder %v1205_v25, 16 }
 0x154   :  { %v289_v29 = vadd.f32 %v1178_v2, %v288_v27  ;;  %v370_v32 = vsel %vm338_vm6, %v319_v28, %v354_v30 }
 0x155   :  { %450 = vmatmul.f32.gmra.mxu3 %v370_v32 }
 0x156   :  { %vm328_vm7 = vcmp.ge.f32.partialorder %v289_v29, 0.0  ;;  %v344_v31 = vmul.f32 0.01, %v289_v29 }
 0x157   :  { %v321_v34 = vpop.f32.mrf.mxu3 }
 0x158   :  { %v360_v33 = vsel %vm328_vm7, %v289_v29, %v344_v31  ;;  %v322_v36 = vadd.f32 %v1178_v2, %v321_v34 }
 0x159   :  { %420 = vmatmul.f32.gmra.mxu2 %v360_v33 }
 0x15a   :  { %vm339_vm8 = vcmp.ge.f32.partialorder %v322_v36, 0.0  ;;  %v355_v38 = vmul.f32 0.01, %v322_v36 }
 0x15b   :  { %v291_v35 = vpop.f32.mrf.mxu1 }
 0x15c   :  { %v292_v37 = vadd.f32 %v1178_v2, %v291_v35  ;;  %v371_v40 = vsel %vm339_vm8, %v322_v36, %v355_v38 }
 0x15d   :  { %453 = vmatmul.f32.gmra.mxu3 %v371_v40 }
 0x15e   :  { %vm329_vm9 = vcmp.ge.f32.partialorder %v292_v37, 0.0  ;;  %v345_v39 = vmul.f32 0.01, %v292_v37 }
 0x160   :  { %v361_v41 = vsel %vm329_vm9, %v292_v37, %v345_v39 }
 0x161   :  { %423 = vmatmul.f32.gmra.mxu2 %v361_v41 }
 0x163   :  { %v294_v42 = vpop.f32.mrf.mxu1 }
 0x164   :  { %v295_v43 = vadd.f32 %v1178_v2, %v294_v42 }
 0x166   :  { %vm330_vm10 = vcmp.ge.f32.partialorder %v295_v43, 0.0  ;;  %v346_v44 = vmul.f32 0.01, %v295_v43 }
 0x168   :  { %v362_v45 = vsel %vm330_vm10, %v295_v43, %v346_v44 }
 0x169   :  { %426 = vmatmul.f32.gmra.mxu2 %v362_v45 }
 0x16b   :  { %v297_v46 = vpop.f32.mrf.mxu1 }
 0x16c   :  { %v298_v47 = vadd.f32 %v1178_v2, %v297_v46 }
 0x16e   :  { %vm331_vm11 = vcmp.ge.f32.partialorder %v298_v47, 0.0  ;;  %v347_v49 = vmul.f32 0.01, %v298_v47 }
 0x170   :  { %v363_v50 = vsel %vm331_vm11, %v298_v47, %v347_v49 }
 0x171   :  { %429 = vmatmul.f32.gmra.mxu2 %v363_v50 }
 0x173   :  { %v300_v51 = vpop.f32.mrf.mxu1 }
 0x174   :  { %v301_v52 = vadd.f32 %v1178_v2, %v300_v51 }
 0x176   :  { %vm332_vm12 = vcmp.ge.f32.partialorder %v301_v52, 0.0  ;;  %v348_v53 = vmul.f32 0.01, %v301_v52 }
 0x178   :  { %v364_v54 = vsel %vm332_vm12, %v301_v52, %v348_v53 }
 0x179   :  { %432 = vmatmul.f32.gmra.mxu2 %v364_v54 }
 0x17b   :  { %v303_v55 = vpop.f32.mrf.mxu1 }
 0x17c   :  { %v304_v56 = vadd.f32 %v1178_v2, %v303_v55 }
 0x17e   :  { %vm333_vm13 = vcmp.ge.f32.partialorder %v304_v56, 0.0  ;;  %v349_v57 = vmul.f32 0.01, %v304_v56 }
 0x180   :  { %v365_v58 = vsel %vm333_vm13, %v304_v56, %v349_v57 }
 0x181   :  { %435 = vmatmul.f32.gmra.mxu2 %v365_v58 }
 0x183   :  { %v306_v59 = vpop.f32.mrf.mxu1 }
 0x184   :  { %v307_v60 = vadd.f32 %v1178_v2, %v306_v59 }
 0x186   :  { %vm334_vm14 = vcmp.ge.f32.partialorder %v307_v60, 0.0  ;;  %v350_v61 = vmul.f32 0.01, %v307_v60 }
 0x188   :  { %v366_v62 = vsel %vm334_vm14, %v307_v60, %v350_v61 }
 0x189   :  { %438 = vmatmul.f32.gmra.mxu2 %v366_v62 }
 0x18b   :  { %v309_v63 = vpop.f32.mrf.mxu1 }
 0x18c   :  { %v310_v0 = vadd.f32 %v1178_v2, %v309_v63 }
 0x18e   :  { %vm335_vm15 = vcmp.ge.f32.partialorder %v310_v0, 0.0  ;;  %v351_v1 = vmul.f32 0.01, %v310_v0 }
 0x190   :  { %v367_v3 = vsel %vm335_vm15, %v310_v0, %v351_v1 }
 0x191   :  { %441 = vmatmul.f32.gmra.mxu2 %v367_v3 }
 0x1bc   :  { %v409_v4 = vpop.f32.mrf.mxu2 }
 0x1bd   :  { %v410_v5 = vadd.f32 %v1199_v48, %v409_v4 }
 0x1bf   :  { %v817_v6 = vmul.f32 -1.442695, %v410_v5 }
 0x1c1   :  { %891 = vpow2.f32 %v817_v6 }
 0x1c4   :  { %v412_v7 = vpop.f32.mrf.mxu2 }
 0x1c5   :  { %v413_v8 = vadd.f32 %v1199_v48, %v412_v7 }
 0x1c7   :  { %v892_v9 = vpop.eup %891  ;;  %v818_v10 = vmul.f32 -1.442695, %v413_v8 }
 0x1c8   :  { %v505_v2 = vadd.f32 1.0, %v892_v9  ;;  %v445_v12 = vpop.f32.mrf.mxu3 }
 0x1c9   :  { %893 = vpow2.f32 %v818_v10  ;;  %v446_v14 = vadd.f32 %v1199_v48, %v445_v12 }
 0x1ca   :  { %895 = vrcp.f32 %v505_v2  ;;  %v530_v23 = vand.u32 2147483647, %v505_v2  ;;  %v532_v24 = vand.u32 2147483648, %v505_v2  ;;  %vm526_vm1 = vweird.f32 %v505_v2 }
 0x1cb   :  { %v829_v17 = vmul.f32 -1.442695, %v446_v14 }
 0x1cc   :  { %v415_v11 = vpop.f32.mrf.mxu2  ;;  %v533_v35 = vor.u32 1.1754944e-38, %v532_v24  ;;  %vm531_vm4 = vcmp.eq.f32.partialorder %v530_v23, 8.507059e+37 }
 0x1cd   :  { %v416_v13 = vadd.f32 %v1199_v48, %v415_v11 }
 0x1cf   :  { %v894_v15 = vpop.eup %893  ;;  %v819_v16 = vmul.f32 -1.442695, %v416_v13 }
 0x1d0   :  { %v896_v18 = vpop.eup %895  ;;  %v506_v20 = vadd.f32 1.0, %v894_v15  ;;  %v448_v27 = vpop.f32.mrf.mxu3 }
 0x1d1   :  { %v522_v21 = vmul.f32 %v896_v18, %v505_v2  ;;  %897 = vpow2.f32 %v819_v16  ;;  %vm527_vm0 = vweird.f32 %v896_v18  ;;  %v449_v30 = vadd.f32 %v1199_v48, %v448_v27 }
 0x1d2   :  { %899 = vrcp.f32 %v506_v20  ;;  %vm528_vm2 = vmor %vm526_vm1, %vm527_vm0  ;;  %v545_v45 = vand.u32 2147483647, %v506_v20  ;;  %v547_v46 = vand.u32 2147483648, %v506_v20  ;;  %vm541_vm6 = vweird.f32 %v506_v20 }
 0x1d3   :  { %v523_v22 = vsub.f32 1.0, %v522_v21  ;;  %901 = vpow2.f32 %v829_v17  ;;  %v830_v37 = vmul.f32 -1.442695, %v449_v30 }
 0x1d4   :  { %v418_v26 = vpop.f32.mrf.mxu2  ;;  %v548_v57 = vor.u32 1.1754944e-38, %v547_v46  ;;  %vm546_vm8 = vcmp.eq.f32.partialorder %v545_v45, 8.507059e+37 }
 0x1d5   :  { %v524_v28 = vmul.f32 %v896_v18, %v523_v22  ;;  %v419_v29 = vadd.f32 %v1199_v48, %v418_v26 }
 0x1d7   :  { %v898_v31 = vpop.eup %897  ;;  %v525_v32 = vadd.f32 %v896_v18, %v524_v28  ;;  %v820_v33 = vmul.f32 -1.442695, %v419_v29 }
 0x1d8   :  { %v900_v34 = vpop.eup %899  ;;  %v1210_v36 = vadd.f32 1.0, %v898_v31  ;;  %v451_v51 = vpop.f32.mrf.mxu3 }
 0x1d9   :  { %v902_v38 = vpop.eup %901  ;;  %v529_v39 = vsel %vm528_vm2, %v896_v18, %v525_v32  ;;  %v537_v40 = vmul.f32 %v900_v34, %v506_v20  ;;  %903 = vpow2.f32 %v820_v33  ;;  %vm542_vm5 = vweird.f32 %v900_v34 }
 0x1da   :  { %v534_v41 = vsel %vm531_vm4, %v533_v35, %v529_v39  ;;  %905 = vrcp.f32 %v1210_v36  ;;  %v1215_v44 = vadd.f32 1.0, %v902_v38  ;;  %v452_v55 = vadd.f32 %v1199_v48, %v451_v51  ;;  %vm543_vm7 = vmor %vm541_vm6, %vm542_vm5 }
 0x1db   :  { %v764_v42 = vsel %vm763_vm3, %v534_v41, 0.0  ;;  %v538_v43 = vsub.f32 1.0, %v537_v40  ;;  %907 = vpow2.f32 %v830_v37  ;;  %v562_v58 = vand.u32 2147483648, %v1210_v36 }
 0x1dc   :  { %780 = vst [vmem:[#allocation10] sm:$0xff] %v764_v42  ;;  %v421_v47 = vpop.f32.mrf.mxu2  ;;  %909 = vrcp.f32 %v1215_v44  ;;  %vm556_vm9 = vweird.f32 %v1210_v36  ;;  %v831_v5 = vmul.f32 -1.442695, %v452_v55  ;;  %v560_v6 = vand.u32 2147483647, %v1210_v36 }
 0x1dd   :  { %v539_v49 = vmul.f32 %v900_v34, %v538_v43  ;;  %v422_v50 = vadd.f32 %v1199_v48, %v421_v47  ;;  %v563_v7 = vor.u32 1.1754944e-38, %v562_v58  ;;  %vm706_vm11 = vweird.f32 %v1215_v44 }
 0x1de   :  { %v712_v14 = vand.u32 2147483648, %v1215_v44  ;;  %v710_v18 = vand.u32 2147483647, %v1215_v44  ;;  %vm561_vm14 = vcmp.eq.f32.partialorder %v560_v6, 8.507059e+37 }
 0x1df   :  { %v904_v52 = vpop.eup %903  ;;  %v540_v53 = vadd.f32 %v900_v34, %v539_v49  ;;  %v821_v54 = vmul.f32 -1.442695, %v422_v50 }
 0x1e0   :  { %v906_v56 = vpop.eup %905  ;;  %v1221_v59 = vadd.f32 1.0, %v904_v52  ;;  %v454_v12 = vpop.f32.mrf.mxu3  ;;  %v713_v29 = vor.u32 1.1754944e-38, %v712_v14  ;;  %vm711_vm0 = vcmp.eq.f32.partialorder %v710_v18, 8.507059e+37 }
 0x1e1   :  { %v544_v60 = vsel %vm543_vm7, %v900_v34, %v540_v53  ;;  %v552_v61 = vmul.f32 %v906_v56, %v1210_v36  ;;  %911 = vpow2.f32 %v821_v54  ;;  %v908_v62 = vpop.eup %907  ;;  %vm557_vm10 = vweird.f32 %v906_v56 }
 0x1e2   :  { %v549_v63 = vsel %vm546_vm8, %v548_v57, %v544_v60  ;;  %913 = vrcp.f32 %v1221_v59  ;;  %v910_v0 = vpop.eup %909  ;;  %v1228_v4 = vadd.f32 1.0, %v908_v62  ;;  %v575_v2 = vand.u32 2147483647, %v1221_v59  ;;  %vm558_vm13 = vmor %vm556_vm9, %vm557_vm10 }
 0x1e3   :  { %v765_v1 = vsel %vm763_vm3, %v549_v63, 0.0  ;;  %v553_v3 = vsub.f32 1.0, %v552_v61  ;;  %v702_v9 = vmul.f32 %v910_v0, %v1215_v44  ;;  %vm707_vm12 = vweird.f32 %v910_v0 }
 0x1e4   :  { %781 = vst [vmem:[#allocation10 + $0x8] sm:$0xff] %v765_v1  ;;  %v424_v8 = vpop.f32.mrf.mxu2  ;;  %915 = vrcp.f32 %v1228_v4  ;;  %v577_v20 = vand.u32 2147483648, %v1221_v59  ;;  %v455_v23 = vadd.f32 %v1199_v48, %v454_v12  ;;  %vm1250_vm15 = vmor %vm706_vm11, %vm707_vm12  ;;  %vm571_vm1 = vweird.f32 %v1221_v59 }
 0x1e5   :  { %v554_v10 = vmul.f32 %v906_v56, %v553_v3  ;;  %v425_v11 = vadd.f32 %v1199_v48, %v424_v8  ;;  %v703_v13 = vsub.f32 1.0, %v702_v9  ;;  %917 = vpow2.f32 %v831_v5 }
 0x1e6   :  { %vm1257_vm2 = vcmp.eq.f32.partialorder %v575_v2, 8.507059e+37  ;;  %v578_v35 = vor.u32 1.1754944e-38, %v577_v20  ;;  %v832_v37 = vmul.f32 -1.442695, %v455_v23  ;;  %vm721_vm5 = vweird.f32 %v1228_v4 }
 0x1e7   :  { %v912_v15 = vpop.eup %911  ;;  %v555_v16 = vadd.f32 %v906_v56, %v554_v10  ;;  %v822_v17 = vmul.f32 -1.442695, %v425_v11  ;;  %v704_v22 = vmul.f32 %v910_v0, %v703_v13  ;;  %v725_v44 = vand.u32 2147483647, %v1228_v4 }
 0x1e8   :  { %v914_v19 = vpop.eup %913  ;;  %v1242_v21 = vadd.f32 1.0, %v912_v15  ;;  %v727_v50 = vand.u32 2147483648, %v1228_v4 }
 0x1e9   :  { %v559_v24 = vsel %vm558_vm13, %v906_v56, %v555_v16  ;;  %v567_v26 = vmul.f32 %v914_v19, %v1221_v59  ;;  %919 = vpow2.f32 %v822_v17  ;;  %v705_v32 = vadd.f32 %v910_v0, %v704_v22 }
 0x1ea   :  { %v564_v27 = vsel %vm561_vm14, %v563_v7, %v559_v24  ;;  %921 = vrcp.f32 %v1242_v21  ;;  %v916_v33 = vpop.eup %915  ;;  %vm572_vm4 = vweird.f32 %v914_v19  ;;  %v590_v60 = vand.u32 2147483647, %v1242_v21 }
 0x1eb   :  { %v766_v30 = vsel %vm763_vm3, %v564_v27, 0.0  ;;  %v568_v31 = vsub.f32 1.0, %v567_v26  ;;  %v918_v38 = vpop.eup %917  ;;  %v709_v40 = vsel %vm1250_vm15, %v910_v0, %v705_v32  ;;  %v717_v43 = vmul.f32 %v916_v33, %v1228_v4  ;;  %vm573_vm6 = vmor %vm571_vm1, %vm572_vm4 }
 0x1ec   :  { %782 = vst [vmem:[#allocation10 + $0x10] sm:$0xff] %v766_v30  ;;  %v427_v36 = vpop.f32.mrf.mxu2  ;;  %v714_v42 = vsel %vm711_vm0, %v713_v29, %v709_v40  ;;  %v1274_v54 = vadd.f32 1.0, %v918_v38  ;;  %923 = vpow2.f32 %v832_v37  ;;  %vm722_vm7 = vweird.f32 %v916_v33 }
 0x1ed   :  { %v569_v39 = vmul.f32 %v914_v19, %v568_v31  ;;  %v428_v41 = vadd.f32 %v1199_v48, %v427_v36  ;;  %v776_v47 = vsel %vm763_vm3, %v714_v42, 0.0  ;;  %v718_v53 = vsub.f32 1.0, %v717_v43  ;;  %vm1286_vm8 = vmor %vm721_vm5, %vm722_vm7 }
 0x1ee   :  { %792 = vst [vmem:[#allocation10 + $0x60] sm:$0xff] %v776_v47  ;;  %v592_v62 = vand.u32 2147483648, %v1242_v21  ;;  %vm1290_vm9 = vcmp.eq.f32.partialorder %v725_v44, 8.507059e+37  ;;  %v728_v1 = vor.u32 1.1754944e-38, %v727_v50  ;;  %vm586_vm11 = vweird.f32 %v1242_v21 }
 0x1ef   :  { %v920_v45 = vpop.eup %919  ;;  %v570_v46 = vadd.f32 %v914_v19, %v569_v39  ;;  %v823_v49 = vmul.f32 -1.442695, %v428_v41  ;;  %v719_v61 = vmul.f32 %v916_v33, %v718_v53  ;;  %vm591_vm13 = vcmp.eq.f32.partialorder %v590_v60, 8.507059e+37 }
 0x1f0   :  { %v922_v51 = vpop.eup %921  ;;  %v1272_v52 = vadd.f32 1.0, %v920_v45  ;;  %v593_v12 = vor.u32 1.1754944e-38, %v592_v62  ;;  %v740_v27 = vand.u32 2147483647, %v1274_v54  ;;  %v742_v30 = vand.u32 2147483648, %v1274_v54 }
 0x1f1   :  { %v574_v55 = vsel %vm573_vm6, %v914_v19, %v570_v46  ;;  %v582_v56 = vmul.f32 %v922_v51, %v1242_v21  ;;  %925 = vpow2.f32 %v823_v49  ;;  %vm587_vm10 = vweird.f32 %v922_v51 }
 0x1f2   :  { %v579_v57 = vsel %vm1257_vm2, %v578_v35, %v574_v55  ;;  %927 = vrcp.f32 %v1272_v52  ;;  %v720_v6 = vadd.f32 %v916_v33, %v719_v61  ;;  %v924_v8 = vpop.eup %923  ;;  %vm588_vm12 = vmor %vm586_vm11, %vm587_vm10  ;;  %v605_v23 = vand.u32 2147483647, %v1272_v52 }
 0x1f3   :  { %v767_v58 = vsel %vm763_vm3, %v579_v57, 0.0  ;;  %v583_v59 = vsub.f32 1.0, %v582_v56  ;;  %929 = vrcp.f32 %v1274_v54  ;;  %v1303_v15 = vadd.f32 1.0, %v924_v8 }
 0x1f4   :  { %783 = vst [vmem:[#allocation10 + $0x18] sm:$0xff] %v767_v58  ;;  %v430_v3 = vpop.f32.mrf.mxu2  ;;  %v724_v10 = vsel %vm1286_vm8, %v916_v33, %v720_v6  ;;  %v607_v24 = vand.u32 2147483648, %v1272_v52  ;;  %vm601_vm15 = vweird.f32 %v1272_v52  ;;  %vm736_vm0 = vweird.f32 %v1274_v54 }
 0x1f5   :  { %v584_v5 = vmul.f32 %v922_v51, %v583_v59  ;;  %v431_v7 = vadd.f32 %v1199_v48, %v430_v3  ;;  %v729_v14 = vsel %vm1290_vm9, %v728_v1, %v724_v10  ;;  %vm606_vm4 = vcmp.eq.f32.partialorder %v605_v23, 8.507059e+37 }
 0x1f6   :  { %v777_v18 = vsel %vm763_vm3, %v729_v14, 0.0  ;;  %v608_v36 = vor.u32 1.1754944e-38, %v607_v24  ;;  %vm1320_vm5 = vcmp.eq.f32.partialorder %v740_v27, 8.507059e+37  ;;  %v743_v42 = vor.u32 1.1754944e-38, %v742_v30 }
 0x1f7   :  { %v926_v9 = vpop.eup %925  ;;  %v585_v4 = vadd.f32 %v922_v51, %v584_v5  ;;  %v824_v2 = vmul.f32 -1.442695, %v431_v7  ;;  %793 = vst [vmem:[#allocation10 + $0x68] sm:$0xff] %v777_v18  ;;  %vm751_vm9 = vweird.f32 %v1303_v15  ;;  %v755_v61 = vand.u32 2147483647, %v1303_v15 }
 0x1f8   :  { %v928_v11 = vpop.eup %927  ;;  %v1299_v13 = vadd.f32 1.0, %v926_v9 }
 0x1f9   :  { %v589_v16 = vsel %vm588_vm12, %v922_v51, %v585_v4  ;;  %v597_v17 = vmul.f32 %v928_v11, %v1272_v52  ;;  %v930_v19 = vpop.eup %929  ;;  %vm602_vm14 = vweird.f32 %v928_v11 }
 0x1fa   :  { %v594_v20 = vsel %vm591_vm13, %v593_v12, %v589_v16  ;;  %931 = vrcp.f32 %v1299_v13  ;;  %v732_v26 = vmul.f32 %v930_v19, %v1274_v54  ;;  %vm737_vm1 = vweird.f32 %v930_v19  ;;  %vm603_vm2 = vmor %vm601_vm15, %vm602_vm14 }
 0x1fb   :  { %v768_v21 = vsel %vm763_vm3, %v594_v20, 0.0  ;;  %v598_v22 = vsub.f32 1.0, %v597_v17  ;;  %933 = vpow2.f32 %v824_v2  ;;  %vm616_vm6 = vweird.f32 %v1299_v13  ;;  %vm1331_vm7 = vmor %vm736_vm0, %vm737_vm1 }
 0x1fc   :  { %784 = vst [vmem:[#allocation10 + $0x20] sm:$0xff] %v768_v21  ;;  %v433_v28 = vpop.f32.mrf.mxu2  ;;  %935 = vrcp.f32 %v1303_v15  ;;  %v733_v32 = vsub.f32 1.0, %v732_v26  ;;  %v620_v51 = vand.u32 2147483647, %v1299_v13  ;;  %v622_v53 = vand.u32 2147483648, %v1299_v13 }
 0x1fd   :  { %v599_v29 = vmul.f32 %v928_v11, %v598_v22  ;;  %v434_v31 = vadd.f32 %v1199_v48, %v433_v28  ;;  %v757_v54 = vand.u32 2147483648, %v1303_v15  ;;  %vm756_vm14 = vcmp.eq.f32.partialorder %v755_v61, 8.507059e+37 }
 0x1fe   :  { %v734_v37 = vmul.f32 %v930_v19, %v733_v32  ;;  %vm621_vm12 = vcmp.eq.f32.partialorder %v620_v51, 8.507059e+37  ;;  %v623_v5 = vor.u32 1.1754944e-38, %v622_v53 }
 0x1ff   :  { %v600_v33 = vadd.f32 %v928_v11, %v599_v29  ;;  %v825_v34 = vmul.f32 -1.442695, %v434_v31  ;;  %v758_v9 = vor.u32 1.1754944e-38, %v757_v54 }
 0x200   :  { %v932_v35 = vpop.eup %931  ;;  %v735_v46 = vadd.f32 %v930_v19, %v734_v37 }
 0x201   :  { %v934_v39 = vpop.eup %933  ;;  %v604_v40 = vsel %vm603_vm2, %v928_v11, %v600_v33  ;;  %v612_v41 = vmul.f32 %v932_v35, %v1299_v13  ;;  %937 = vpow2.f32 %v825_v34  ;;  %vm617_vm8 = vweird.f32 %v932_v35 }
 0x202   :  { %v936_v43 = vpop.eup %935  ;;  %v609_v44 = vsel %vm606_vm4, %v608_v36, %v604_v40  ;;  %v1326_v45 = vadd.f32 1.0, %v934_v39  ;;  %v739_v57 = vsel %vm1331_vm7, %v930_v19, %v735_v46  ;;  %vm618_vm11 = vmor %vm616_vm6, %vm617_vm8 }
 0x203   :  { %v769_v49 = vsel %vm763_vm3, %v609_v44, 0.0  ;;  %v613_v50 = vsub.f32 1.0, %v612_v41  ;;  %v747_v52 = vmul.f32 %v936_v43, %v1303_v15  ;;  %v744_v60 = vsel %vm1320_vm5, %v743_v42, %v739_v57 }
 0x204   :  { %785 = vst [vmem:[#allocation10 + $0x28] sm:$0xff] %v769_v49  ;;  %939 = vrcp.f32 %v1326_v45  ;;  %v436_v55 = vpop.f32.mrf.mxu2  ;;  %vm752_vm10 = vweird.f32 %v936_v43  ;;  %v778_v0 = vsel %vm763_vm3, %v744_v60, 0.0  ;;  %v637_v15 = vand.u32 2147483648, %v1326_v45 }
 0x205   :  { %v614_v56 = vmul.f32 %v932_v35, %v613_v50  ;;  %v748_v58 = vsub.f32 1.0, %v747_v52  ;;  %v437_v59 = vadd.f32 %v1199_v48, %v436_v55  ;;  %794 = vst [vmem:[#allocation10 + $0x70] sm:$0xff] %v778_v0  ;;  %vm753_vm13 = vmor %vm751_vm9, %vm752_vm10  ;;  %v635_v21 = vand.u32 2147483647, %v1326_v45 }
 0x206   :  { %vm631_vm0 = vweird.f32 %v1326_v45  ;;  %v638_v28 = vor.u32 1.1754944e-38, %v637_v15 }
 0x207   :  { %v938_v62 = vpop.eup %937  ;;  %v615_v63 = vadd.f32 %v932_v35, %v614_v56  ;;  %v749_v1 = vmul.f32 %v936_v43, %v748_v58  ;;  %v826_v3 = vmul.f32 -1.442695, %v437_v59  ;;  %vm636_vm2 = vcmp.eq.f32.partialorder %v635_v21, 8.507059e+37 }
 0x208   :  { %v513_v6 = vadd.f32 1.0, %v938_v62 }
 0x209   :  { %v619_v7 = vsel %vm618_vm11, %v932_v35, %v615_v63  ;;  %v750_v8 = vadd.f32 %v936_v43, %v749_v1  ;;  %941 = vpow2.f32 %v826_v3 }
 0x20a   :  { %v940_v4 = vpop.eup %939  ;;  %v624_v10 = vsel %vm621_vm12, %v623_v5, %v619_v7  ;;  %943 = vrcp.f32 %v513_v6  ;;  %v650_v32 = vand.u32 2147483647, %v513_v6  ;;  %v652_v33 = vand.u32 2147483648, %v513_v6 }
 0x20b   :  { %v770_v2 = vsel %vm763_vm3, %v624_v10, 0.0  ;;  %v627_v11 = vmul.f32 %v940_v4, %v1326_v45  ;;  %v754_v12 = vsel %vm753_vm13, %v936_v43, %v750_v8  ;;  %vm632_vm15 = vweird.f32 %v940_v4 }
 0x20c   :  { %786 = vst [vmem:[#allocation10 + $0x30] sm:$0xff] %v770_v2  ;;  %v439_v13 = vpop.f32.mrf.mxu2  ;;  %v759_v16 = vsel %vm756_vm14, %v758_v9, %v754_v12  ;;  %vm633_vm1 = vmor %vm631_vm0, %vm632_vm15  ;;  %vm646_vm5 = vweird.f32 %v513_v6  ;;  %v653_v42 = vor.u32 1.1754944e-38, %v652_v33  ;;  %vm651_vm7 = vcmp.eq.f32.partialorder %v650_v32, 8.507059e+37 }
 0x20d   :  { %v628_v14 = vsub.f32 1.0, %v627_v11  ;;  %v440_v17 = vadd.f32 %v1199_v48, %v439_v13  ;;  %v779_v18 = vsel %vm763_vm3, %v759_v16, 0.0 }
 0x20e   :  { %795 = vst [vmem:[#allocation10 + $0x78] sm:$0xff] %v779_v18 }
 0x20f   :  { %v942_v19 = vpop.eup %941  ;;  %v629_v20 = vmul.f32 %v940_v4, %v628_v14  ;;  %v827_v22 = vmul.f32 -1.442695, %v440_v17 }
 0x210   :  { %v944_v23 = vpop.eup %943  ;;  %v514_v24 = vadd.f32 1.0, %v942_v19 }
 0x211   :  { %v630_v26 = vadd.f32 %v940_v4, %v629_v20  ;;  %v642_v27 = vmul.f32 %v944_v23, %v513_v6  ;;  %945 = vpow2.f32 %v827_v22  ;;  %vm647_vm4 = vweird.f32 %v944_v23 }
 0x212   :  { %947 = vrcp.f32 %v514_v24  ;;  %vm648_vm6 = vmor %vm646_vm5, %vm647_vm4  ;;  %v665_v51 = vand.u32 2147483647, %v514_v24  ;;  %vm661_vm9 = vweird.f32 %v514_v24 }
 0x213   :  { %v634_v29 = vsel %vm633_vm1, %v940_v4, %v630_v26  ;;  %v643_v30 = vsub.f32 1.0, %v642_v27 }
 0x214   :  { %v639_v31 = vsel %vm636_vm2, %v638_v28, %v634_v29  ;;  %v442_v34 = vpop.f32.mrf.mxu2  ;;  %vm666_vm11 = vcmp.eq.f32.partialorder %v665_v51, 8.507059e+37 }
 0x215   :  { %v771_v35 = vsel %vm763_vm3, %v639_v31, 0.0  ;;  %v644_v36 = vmul.f32 %v944_v23, %v643_v30  ;;  %v443_v37 = vadd.f32 %v1199_v48, %v442_v34  ;;  %v667_v48 = vand.u32 2147483648, %v514_v24 }
 0x216   :  { %787 = vst [vmem:[#allocation10 + $0x38] sm:$0xff] %v771_v35 }
 0x217   :  { %v946_v38 = vpop.eup %945  ;;  %v645_v39 = vadd.f32 %v944_v23, %v644_v36  ;;  %v828_v40 = vmul.f32 -1.442695, %v443_v37  ;;  %v668_v55 = vor.u32 1.1754944e-38, %v667_v48 }
 0x218   :  { %v948_v41 = vpop.eup %947  ;;  %v515_v43 = vadd.f32 1.0, %v946_v38 }
 0x219   :  { %v649_v44 = vsel %vm648_vm6, %v944_v23, %v645_v39  ;;  %v657_v45 = vmul.f32 %v948_v41, %v514_v24  ;;  %949 = vpow2.f32 %v828_v40  ;;  %vm662_vm8 = vweird.f32 %v948_v41 }
 0x21a   :  { %v654_v46 = vsel %vm651_vm7, %v653_v42, %v649_v44  ;;  %951 = vrcp.f32 %v515_v43  ;;  %vm663_vm10 = vmor %vm661_vm9, %vm662_vm8  ;;  %v682_v62 = vand.u32 2147483648, %v515_v43  ;;  %v680_v0 = vand.u32 2147483647, %v515_v43 }
 0x21b   :  { %v772_v47 = vsel %vm763_vm3, %v654_v46, 0.0  ;;  %v658_v49 = vsub.f32 1.0, %v657_v45  ;;  %vm676_vm13 = vweird.f32 %v515_v43 }
 0x21c   :  { %788 = vst [vmem:[#allocation10 + $0x40] sm:$0xff] %v772_v47  ;;  %v683_v5 = vor.u32 1.1754944e-38, %v682_v62  ;;  %vm681_vm15 = vcmp.eq.f32.partialorder %v680_v0, 8.507059e+37 }
 0x21d   :  { %v659_v50 = vmul.f32 %v948_v41, %v658_v49 }
 0x21f   :  { %v950_v52 = vpop.eup %949  ;;  %v660_v53 = vadd.f32 %v948_v41, %v659_v50 }
 0x220   :  { %v952_v54 = vpop.eup %951  ;;  %v516_v56 = vadd.f32 1.0, %v950_v52 }
 0x221   :  { %v664_v57 = vsel %vm663_vm10, %v948_v41, %v660_v53  ;;  %v672_v58 = vmul.f32 %v952_v54, %v515_v43  ;;  %vm677_vm12 = vweird.f32 %v952_v54 }
 0x222   :  { %v669_v59 = vsel %vm666_vm11, %v668_v55, %v664_v57  ;;  %953 = vrcp.f32 %v516_v56  ;;  %vm678_vm14 = vmor %vm676_vm13, %vm677_vm12  ;;  %v697_v10 = vand.u32 2147483648, %v516_v56  ;;  %v695_v11 = vand.u32 2147483647, %v516_v56 }
 0x223   :  { %v773_v60 = vsel %vm763_vm3, %v669_v59, 0.0  ;;  %v673_v61 = vsub.f32 1.0, %v672_v58  ;;  %vm691_vm1 = vweird.f32 %v516_v56 }
 0x224   :  { %789 = vst [vmem:[#allocation10 + $0x48] sm:$0xff] %v773_v60  ;;  %v698_v13 = vor.u32 1.1754944e-38, %v697_v10  ;;  %vm696_vm4 = vcmp.eq.f32.partialorder %v695_v11, 8.507059e+37 }
 0x225   :  { %v674_v63 = vmul.f32 %v952_v54, %v673_v61 }
 0x227   :  { %v675_v1 = vadd.f32 %v952_v54, %v674_v63 }
 0x228   :  { %v954_v3 = vpop.eup %953 }
 0x229   :  { %v679_v6 = vsel %vm678_vm14, %v952_v54, %v675_v1  ;;  %v687_v7 = vmul.f32 %v954_v3, %v516_v56  ;;  %vm692_vm0 = vweird.f32 %v954_v3 }
 0x22a   :  { %v684_v8 = vsel %vm681_vm15, %v683_v5, %v679_v6  ;;  %vm693_vm2 = vmor %vm691_vm1, %vm692_vm0 }
 0x22b   :  { %v774_v9 = vsel %vm763_vm3, %v684_v8, 0.0  ;;  %v688_v4 = vsub.f32 1.0, %v687_v7 }
 0x22c   :  { %790 = vst [vmem:[#allocation10 + $0x50] sm:$0xff] %v774_v9 }
 0x22d   :  { %v689_v2 = vmul.f32 %v954_v3, %v688_v4 }
 0x22f   :  { %v690_v12 = vadd.f32 %v954_v3, %v689_v2 }
 0x231   :  { %v694_v14 = vsel %vm693_vm2, %v954_v3, %v690_v12 }
 0x232   :  { %v699_v16 = vsel %vm696_vm4, %v698_v13, %v694_v14 }
 0x233   :  { %v775_v17 = vsel %vm763_vm3, %v699_v16, 0.0 }
 0x234   :  { %791 = vst [vmem:[#allocation10 + $0x58] sm:$0xff] %v775_v17 }
 0x235   :  { %808 = dma.vmem_to_hbm [thread:$0]  %s801_s23, 2048, %s803_s26, [#allocation4], %s1084_s9, %s1084_s9, %s1085_s10  }
 0x236   :  { %1081 = dma.done.wait [#allocation4], 2048  }
 0x237   :  { %1082 = vsyncadd [#allocation4], 4294965248 }
 0x238   :  { %813 = vsyncpa [#allocation3], 1 }
 0x239   :  { %814 = vsyncpa [#allocation6], 1 }
 0x23a   :  { %815 = vsyncpa [#allocation9], 1 }
 0x23b   :  { %816 = vsyncpa [#allocation4], 1 }

</bundles_post_ra>
